<compile_context>
chip_gen: v7x
topology: tpu7x:2x2x1
jax: 0.10.0
libtpu: 0.0.40
codegen_flags: <defaults>
</compile_context>

<pallas_src>
import functools

import jax
import jax.numpy as jnp
import numpy as np
from jax import lax
from jax.experimental import pallas as pl
from jax.experimental.pallas import tpu as pltpu


# ---------------------------------------------------------------------------
# helpers
# ---------------------------------------------------------------------------
def _largest_divisor_leq(n, cap):
    cap = max(1, min(n, cap))
    for d in range(cap, 0, -1):
        if n % d == 0:
            return d
    return 1


@functools.lru_cache(maxsize=None)
def _vmem_limit_bytes():
    """Per-generation VMEM budget (128 MiB on v5e/v6e, 64 MiB on v7x)."""
    try:
        cap = int(pltpu.get_tpu_info().vmem_capacity_bytes)
    except Exception:
        cap = 64 << 20                     # conservative (v7x-sized) fallback
    return min(int(cap * 3 // 4), 100 << 20)


def _itemsize(dtype):
    return np.dtype(dtype).itemsize


# ---------------------------------------------------------------------------
# Pallas kernels
# ---------------------------------------------------------------------------
def _convT_2x2_kernel(x_ref, w_ref, b_ref, o_ref):
    # x: (TR, W, Cin); w: (Cin, 4*C) with columns ordered (kh, kw, c);
    # b: (1, 4*C); o: (TR, 2, W, 2*C) with last dim ordered (kw, c).
    # Single fused MXU matmul; the kh split is two cheap lane slices.
    dn = (((2,), (0,)), ((), ()))
    y = lax.dot_general(x_ref[...], w_ref[...], dn,
                        preferred_element_type=jnp.float32) + b_ref[...]
    c2 = o_ref.shape[-1]
    o_ref[:, 0:1, :, :] = y[:, None, :, :c2].astype(o_ref.dtype)
    o_ref[:, 1:2, :, :] = y[:, None, :, c2:].astype(o_ref.dtype)


def _make_conv3x3_bn_relu_kernel(n_in, TH, W):
    """Conv3x3(pad=1) + folded-BN affine + ReLU over n_in channel-split inputs."""

    def kernel(*refs):
        x_refs = refs[:n_in]                 # each (1, 1, TH+2, W+2, Ci) halo slab
        w_refs = refs[n_in:2 * n_in]         # each (9, Ci, Cout)
        scale_ref = refs[2 * n_in]           # (1, Cout) f32
        bias_ref = refs[2 * n_in + 1]        # (1, Cout) f32
        o_ref = refs[2 * n_in + 2]           # (1, TH, W, Cout)

        dn = (((2,), (0,)), ((), ()))
        acc = None                            # register accumulator, f32
        for x_ref, w_ref in zip(x_refs, w_refs):
            for kh in range(3):
                # Load the (TH, W+2, Ci) row slab once; derive the 3 kw
                # operands from it (no per-tap VMEM re-load).
                slab = x_ref[0, 0, kh:kh + TH, :, :]
                for kw in range(3):
                    d = lax.dot_general(slab[:, kw:kw + W, :],
                                        w_ref[kh * 3 + kw], dn,
                                        preferred_element_type=jnp.float32)
                    acc = d if acc is None else acc + d

        y = acc * scale_ref[...] + bias_ref[...]
        o_ref[0] = jnp.maximum(y, 0.0).astype(o_ref.dtype)

    return kernel


# ---------------------------------------------------------------------------
# Wrappers
# ---------------------------------------------------------------------------
def convtranspose2x2_s2(x_nhwc, w_iokk, b, *, compute_dtype=jnp.bfloat16):
    """ConvTranspose2d(k=2, s=2). Returns (N, 2H, 2W, Cout) in compute_dtype."""
    N, H, W, Cin = x_nhwc.shape
    Cout = w_iokk.shape[1]
    NH = N * H
    isz = _itemsize(compute_dtype)

    # (Cin, Cout, kh, kw) -> (Cin, kh, kw, Cout) -> (Cin, 4*Cout), kh-major cols.
    w_r = jnp.transpose(w_iokk, (0, 2, 3, 1)).reshape(Cin, 4 * Cout)
    w_r = w_r.astype(compute_dtype)
    b4 = jnp.tile(b.reshape(1, Cout).astype(jnp.float32), (1, 4))   # (1, 4*Cout)

    x3 = x_nhwc.reshape(NH, W, Cin).astype(compute_dtype)           # free reshape

    # VMEM-aware row-tile size (double-buffered in/out tiles + f32 result regs).
    tile_budget = _vmem_limit_bytes() // 2
    per_row = (2 * W * Cin * isz
               + 2 * (2 * W * 2 * Cout) * isz
               + (2 * W * 2 * Cout) * 4)
    fixed = 2 * (Cin * 4 * Cout * isz + 4 * Cout * 4)
    tr_cap = max(1, (tile_budget - fixed) // max(1, per_row))
    TR = _largest_divisor_leq(NH, min(tr_cap, max(1, NH // 2)))   # >=2 grid steps

    y = pl.pallas_call(
        _convT_2x2_kernel,
        out_shape=jax.ShapeDtypeStruct((NH, 2, W, 2 * Cout), compute_dtype),
        grid=(NH // TR,),
        in_specs=[
            pl.BlockSpec((TR, W, Cin), lambda i: (i, 0, 0)),
            pl.BlockSpec((Cin, 4 * Cout), lambda i: (0, 0)),
            pl.BlockSpec((1, 4 * Cout), lambda i: (0, 0)),
        ],
        out_specs=pl.BlockSpec((TR, 2, W, 2 * Cout), lambda i: (i, 0, 0, 0)),
        compiler_params=pltpu.CompilerParams(
            dimension_semantics=("parallel",),
            vmem_limit_bytes=_vmem_limit_bytes()),
    )(x3, w_r, b4)

    # (N*H, kh, W, kw*C) -> (N, 2H, 2W, C): pure reshape, no HBM relayout.
    return y.reshape(N, 2 * H, 2 * W, Cout)


def conv3x3_bn_relu(xs, ws_oihw, scale, bias, *,
                    compute_dtype=jnp.bfloat16, out_dtype=jnp.float32):
    """Conv2d(k=3, pad=1) + folded BN affine + ReLU.

    xs:       list of NHWC inputs (channel-split pieces, concat order).
    ws_oihw:  matching list of (Cout, Ci, 3, 3) weight slices.
    Returns (N, H, W, Cout) in out_dtype.
    """
    N, H, W, _ = xs[0].shape
    Cout = ws_oihw[0].shape[0]
    cis = [x.shape[-1] for x in xs]
    for x, w in zip(xs, ws_oihw):
        if w.shape[1] != x.shape[-1]:
            raise ValueError("weight in-channels must match input channels")

    in_isz = _itemsize(compute_dtype)
    out_isz = _itemsize(out_dtype)

    # VMEM-aware row-tile: double-buffered halo-slab inputs + output tile
    # + f32 register accumulator.
    tile_budget = _vmem_limit_bytes() // 2
    per_row = (2 * sum(cis) * (W + 2) * in_isz      # input slabs (both buffers)
               + 2 * W * Cout * out_isz             # output tile (both buffers)
               + W * Cout * 4)                      # f32 accumulator
    fixed = (2 * 2 * sum(cis) * (W + 2) * in_isz    # 2 halo rows per slab
             + sum(9 * ci * Cout * in_isz for ci in cis)
             + 2 * Cout * 4)
    th_cap = max(1, (tile_budget - fixed) // max(1, per_row))
    TH = _largest_divisor_leq(H, min(th_cap, max(1, H // 2)))     # >=2 row tiles
    nT = H // TH

    # Halo row slabs: (N, nT, TH+2, W+2, Ci). Per-step VMEM is O(TH*W*Ci).
    # TODO(synk): replace this repack with in-kernel manual DMA + zeroed halo.
    row_idx = jnp.arange(nT)[:, None] * TH + jnp.arange(TH + 2)[None, :]
    slabs = []
    for x in xs:
        xp = jnp.pad(x.astype(compute_dtype), ((0, 0), (1, 1), (1, 1), (0, 0)))
        slabs.append(xp[:, row_idx])               # (N, nT, TH+2, W+2, Ci)

    wts = [jnp.transpose(w, (2, 3, 1, 0)).reshape(9, w.shape[1], Cout)
           .astype(compute_dtype) for w in ws_oihw]
    scale_r = scale.reshape(1, Cout).astype(jnp.float32)
    bias_r = bias.reshape(1, Cout).astype(jnp.float32)

    n_in = len(xs)
    kernel = _make_conv3x3_bn_relu_kernel(n_in, TH, W)

    in_specs = (
        [pl.BlockSpec((1, 1, TH + 2, W + 2, ci), lambda n, t: (n, t, 0, 0, 0))
         for ci in cis]
        + [pl.BlockSpec((9, ci, Cout), lambda n, t: (0, 0, 0)) for ci in cis]
        + [pl.BlockSpec((1, Cout), lambda n, t: (0, 0)),
           pl.BlockSpec((1, Cout), lambda n, t: (0, 0))]
    )

    return pl.pallas_call(
        kernel,
        out_shape=jax.ShapeDtypeStruct((N, H, W, Cout), out_dtype),
        grid=(N, nT),
        in_specs=in_specs,
        out_specs=pl.BlockSpec((1, TH, W, Cout), lambda n, t: (n, t, 0, 0)),
        compiler_params=pltpu.CompilerParams(
            dimension_semantics=("parallel", "parallel"),
            vmem_limit_bytes=_vmem_limit_bytes()),
    )(*slabs, *wts, scale_r, bias_r)


def _bn_fold(gamma, beta, mean, var, conv_b, eps=1e-5):
    scale = gamma / jnp.sqrt(var + eps)
    bias = scale * (conv_b - mean) + beta
    return scale, bias


def upsample_forward(x1_nchw, x2_nchw, p, compute_dtype=jnp.bfloat16):
    # NCHW -> NHWC once at the block boundary.
    # TODO(synk): in a full UNet keep the whole decoder in NHWC instead.
    x1 = jnp.transpose(x1_nchw, (0, 2, 3, 1))
    x2 = jnp.transpose(x2_nchw, (0, 2, 3, 1))
    C2 = x2.shape[-1]                               # = in_c // 2

    # self.up = ConvTranspose2d(in_c, in_c//2, 2, stride=2)
    x1u = convtranspose2x2_s2(x1, p["up_w"], p["up_b"],
                              compute_dtype=compute_dtype)

    # F.pad to x2 spatial size (no-op for the standard 2x case).
    diffY = x2.shape[1] - x1u.shape[1]
    diffX = x2.shape[2] - x1u.shape[2]
    if diffY or diffX:
        x1u = jnp.pad(x1u, ((0, 0),
                            (diffY // 2, diffY - diffY // 2),
                            (diffX // 2, diffX - diffX // 2),
                            (0, 0)))

    # torch.cat([x2, x1], dim=1) fused into the first conv: split weights.
    w1_a = p["conv1_w"][:, :C2]
    w1_b = p["conv1_w"][:, C2:]
    s1, b1 = _bn_fold(p["bn1_g"], p["bn1_b"], p["bn1_m"], p["bn1_v"], p["conv1_b"])
    y = conv3x3_bn_relu([x2, x1u], [w1_a, w1_b], s1, b1,
                        compute_dtype=compute_dtype, out_dtype=compute_dtype)

    s2, b2 = _bn_fold(p["bn2_g"], p["bn2_b"], p["bn2_m"], p["bn2_v"], p["conv2_b"])
    y = conv3x3_bn_relu([y], [p["conv2_w"]], s2, b2,
                        compute_dtype=compute_dtype, out_dtype=jnp.float32)

    return jnp.transpose(y, (0, 3, 1, 2))           # back to NCHW, f32


# ---------------------------------------------------------------------------
# Pure-JAX reference for correctness check
# ---------------------------------------------------------------------------
def _ref_conv_bn_relu(x, w_oihw, conv_b, gamma, beta, mean, var, eps=1e-5):
    w_hwio = jnp.transpose(w_oihw, (2, 3, 1, 0))
    y = lax.conv_general_dilated(
        x, w_hwio, (1, 1), "SAME",
        dimension_numbers=("NHWC", "HWIO", "NHWC"),
        precision=lax.Precision.HIGHEST) + conv_b
    y = gamma * (y - mean) / jnp.sqrt(var + eps) + beta
    return jnp.maximum(y, 0.0)


def ref_forward(x1_nchw, x2_nchw, p):
    x1 = jnp.transpose(x1_nchw, (0, 2, 3, 1))
    x2 = jnp.transpose(x2_nchw, (0, 2, 3, 1))
    N, H, W, _ = x1.shape
    Co = p["up_w"].shape[1]
    up = jnp.einsum("nhwi,iokl->nhwklo", x1, p["up_w"],
                    precision=lax.Precision.HIGHEST) + p["up_b"]
    up = jnp.transpose(up, (0, 1, 3, 2, 4, 5)).reshape(N, 2 * H, 2 * W, Co)
    diffY = x2.shape[1] - up.shape[1]
    diffX = x2.shape[2] - up.shape[2]
    up = jnp.pad(up, ((0, 0),
                      (diffY // 2, diffY - diffY // 2),
                      (diffX // 2, diffX - diffX // 2),
                      (0, 0)))
    x = jnp.concatenate([x2, up], axis=-1)
    y = _ref_conv_bn_relu(x, p["conv1_w"], p["conv1_b"],
                          p["bn1_g"], p["bn1_b"], p["bn1_m"], p["bn1_v"])
    y = _ref_conv_bn_relu(y, p["conv2_w"], p["conv2_b"],
                          p["bn2_g"], p["bn2_b"], p["bn2_m"], p["bn2_v"])
    return jnp.transpose(y, (0, 3, 1, 2))


# ---------------------------------------------------------------------------
if __name__ == "__main__":
    in_c, out_c = 8, 4
    N, H1, W1 = 2, 8, 8
    H2, W2 = 2 * H1, 2 * W1

    key = jax.random.PRNGKey(0)
    ks = jax.random.split(key, 16)
    f32 = jnp.float32

    x1 = jax.random.normal(ks[0], (N, in_c, H1, W1), f32)          # bottom feature
    x2 = jax.random.normal(ks[1], (N, in_c // 2, H2, W2), f32)     # skip connection

    params = {
        # ConvTranspose2d(in_c, in_c//2, 2, 2): weight (in_c, in_c//2, 2, 2)
        "up_w": 0.1 * jax.random.normal(ks[2], (in_c, in_c // 2, 2, 2), f32),
        "up_b": 0.1 * jax.random.normal(ks[3], (in_c // 2,), f32),
        # Conv2d(in_c, out_c, 3, padding=1): weight OIHW
        "conv1_w": 0.1 * jax.random.normal(ks[4], (out_c, in_c, 3, 3), f32),
        "conv1_b": 0.1 * jax.random.normal(ks[5], (out_c,), f32),
        "bn1_g": 1.0 + 0.1 * jax.random.normal(ks[6], (out_c,), f32),
        "bn1_b": 0.1 * jax.random.normal(ks[7], (out_c,), f32),
        "bn1_m": 0.1 * jax.random.normal(ks[8], (out_c,), f32),
        "bn1_v": jax.random.uniform(ks[9], (out_c,), f32, 0.5, 1.5),
        # Conv2d(out_c, out_c, 3, padding=1)
        "conv2_w": 0.1 * jax.random.normal(ks[10], (out_c, out_c, 3, 3), f32),
        "conv2_b": 0.1 * jax.random.normal(ks[11], (out_c,), f32),
        "bn2_g": 1.0 + 0.1 * jax.random.normal(ks[12], (out_c,), f32),
        "bn2_b": 0.1 * jax.random.normal(ks[13], (out_c,), f32),
        "bn2_m": 0.1 * jax.random.normal(ks[14], (out_c,), f32),
        "bn2_v": jax.random.uniform(ks[15], (out_c,), f32, 0.5, 1.5),
    }

    ref = jax.block_until_ready(ref_forward(x1, x2, params))

    # f32 compute path (tight correctness check).
    out_f32 = jax.block_until_ready(
        upsample_forward(x1, x2, params, compute_dtype=jnp.float32))
    assert out_f32.shape == (N, out_c, H2, W2), out_f32.shape
    err_f32 = float(jnp.max(jnp.abs(out_f32 - ref)))
    assert err_f32 < 1e-2, f"f32 mismatch vs reference: {err_f32}"

    # bf16 MXU path (default performance configuration).
    out_bf16 = jax.block_until_ready(upsample_forward(x1, x2, params))
    assert out_bf16.shape == (N, out_c, H2, W2), out_bf16.shape
    err_bf16 = float(jnp.max(jnp.abs(out_bf16 - ref)))
    assert err_bf16 < 5e-2, f"bf16 mismatch vs reference: {err_bf16}"

    print("KERNEL_OK")
</pallas_src>

<mosaic_0001>
module attributes {stable_mosaic.version = 11 : i64} {
  func.func @_convT_2x2_kernel(%arg0: i32, %arg1: memref<8x8x8xf32, #tpu.memory_space<vmem>>, %arg2: memref<8x16xf32, #tpu.memory_space<vmem>>, %arg3: memref<1x16xf32, #tpu.memory_space<vmem>>, %arg4: memref<8x2x8x8xf32, #tpu.memory_space<vmem>>) attributes {dimension_semantics = [#tpu.dimension_semantics<parallel>], iteration_bounds = array<i64: 2>, scalar_prefetch = 0 : i64, scratch_operands = 0 : i64, tpu.core_type = #tpu.core_type<tc>, window_params = [{transform_indices = @transform_0, window_bounds = array<i64: 8, 8, 8>}, {pipeline_mode = #tpu.pipeline_mode<synchronous>, transform_indices = @transform_1, window_bounds = array<i64: 8, 16>}, {pipeline_mode = #tpu.pipeline_mode<synchronous>, transform_indices = @transform_2, window_bounds = array<i64: 1, 16>}, {transform_indices = @transform_3, window_bounds = array<i64: 8, 2, 8, 8>}]} {
    %c0 = arith.constant 0 : index
    %c0_0 = arith.constant 0 : index
    %c0_1 = arith.constant 0 : index
    %0 = vector.load %arg1[%c0, %c0_0, %c0_1] : memref<8x8x8xf32, #tpu.memory_space<vmem>>, vector<8x8x8xf32>
    %c0_2 = arith.constant 0 : index
    %c0_3 = arith.constant 0 : index
    %1 = vector.load %arg2[%c0_2, %c0_3] : memref<8x16xf32, #tpu.memory_space<vmem>>, vector<8x16xf32>
    %cst = arith.constant dense<0.000000e+00> : vector<8x8x16xf32>
    %2 = tpu.matmul %0, %1, %cst {dimension_numbers = #tpu.dot_dimension_numbers<[2], [0], [0, 1], [1], [0, 0, 0, 1, 1, 1], [], []>} : vector<8x8x8xf32>, vector<8x16xf32>, vector<8x8x16xf32> -> vector<8x8x16xf32>
    %c0_4 = arith.constant 0 : index
    %c0_5 = arith.constant 0 : index
    %3 = vector.load %arg3[%c0_4, %c0_5] : memref<1x16xf32, #tpu.memory_space<vmem>>, vector<1x16xf32>
    %4 = vector.shape_cast %3 : vector<1x16xf32> to vector<1x1x16xf32>
    %5 = vector.broadcast %4 : vector<1x1x16xf32> to vector<8x8x16xf32>
    %6 = arith.addf %2, %5 : vector<8x8x16xf32>
    %7 = vector.extract_strided_slice %6 {offsets = [0, 0, 0], sizes = [8, 8, 8], strides = [1, 1, 1]} : vector<8x8x16xf32> to vector<8x8x8xf32>
    %8 = vector.shape_cast %7 : vector<8x8x8xf32> to vector<8x1x8x8xf32>
    %c0_6 = arith.constant 0 : index
    %c0_7 = arith.constant 0 : index
    %c0_8 = arith.constant 0 : index
    %c0_9 = arith.constant 0 : index
    %9 = vector.load %arg4[%c0_6, %c0_7, %c0_8, %c0_9] : memref<8x2x8x8xf32, #tpu.memory_space<vmem>>, vector<8x1x8x8xf32>
    tpu.vector_store %arg4[%c0_6, %c0_7, %c0_8, %c0_9], %8 {strides = array<i32>} : memref<8x2x8x8xf32, #tpu.memory_space<vmem>>, vector<8x1x8x8xf32>,
    %10 = vector.extract_strided_slice %6 {offsets = [0, 0, 8], sizes = [8, 8, 8], strides = [1, 1, 1]} : vector<8x8x16xf32> to vector<8x8x8xf32>
    %11 = vector.shape_cast %10 : vector<8x8x8xf32> to vector<8x1x8x8xf32>
    %c0_10 = arith.constant 0 : index
    %c1 = arith.constant 1 : index
    %c0_11 = arith.constant 0 : index
    %c0_12 = arith.constant 0 : index
    %12 = vector.load %arg4[%c0_10, %c1, %c0_11, %c0_12] : memref<8x2x8x8xf32, #tpu.memory_space<vmem>>, vector<8x1x8x8xf32>
    tpu.vector_store %arg4[%c0_10, %c1, %c0_11, %c0_12], %11 {strides = array<i32>} : memref<8x2x8x8xf32, #tpu.memory_space<vmem>>, vector<8x1x8x8xf32>,
    return
  }
  func.func @transform_0(%arg0: i32) -> (i32, i32, i32) {
    %c0_i32 = arith.constant 0 : i32
    %c0_i32_0 = arith.constant 0 : i32
    %c0_i32_1 = arith.constant 0 : i32
    return %arg0, %c0_i32, %c0_i32_0 : i32, i32, i32
  }
  func.func @transform_1(%arg0: i32) -> (i32, i32) {
    %c0_i32 = arith.constant 0 : i32
    %c0_i32_0 = arith.constant 0 : i32
    %c0_i32_1 = arith.constant 0 : i32
    return %c0_i32, %c0_i32_0 : i32, i32
  }
  func.func @transform_2(%arg0: i32) -> (i32, i32) {
    %c0_i32 = arith.constant 0 : i32
    %c0_i32_0 = arith.constant 0 : i32
    %c0_i32_1 = arith.constant 0 : i32
    return %c0_i32, %c0_i32_0 : i32, i32
  }
  func.func @transform_3(%arg0: i32) -> (i32, i32, i32, i32) {
    %c0_i32 = arith.constant 0 : i32
    %c0_i32_0 = arith.constant 0 : i32
    %c0_i32_1 = arith.constant 0 : i32
    %c0_i32_2 = arith.constant 0 : i32
    return %arg0, %c0_i32, %c0_i32_0, %c0_i32_1 : i32, i32, i32, i32
  }
}

</mosaic_0001>

<bundles_post_ra>
// kernel: tpu_custom_call.1
= control target key start
LH: loop header
LB: loop body
LE: loop exit
PB: predicated region body
PF: predicated region fallthrough
CT: control target
= control target key end

     0   :  { %s522_s12 = smov 0   ;;  %s587_s0 = inlined_call_operand.vmem [shape: f32[16,8,8], index: 0, kind: input, shape index: {}]   ;;  %s588_s1 = inlined_call_operand.vmem [shape: f32[8,16], index: 1, kind: input, shape index: {}]   ;;  %s589_s2 = inlined_call_operand.vmem [shape: f32[1,16], index: 2, kind: input, shape index: {}]   ;;  %s590_s3 = inlined_call_operand.vmem [shape: f32[16,2,8,8], index: 3, kind: output, shape index: {}]  }
   0x1 LB: > { %s429_s13 = sadd.s32 4294967295, %s499_s12   ;;  %p433_p0 = scmp.ge.s32.totalorder %s499_s12, 1  ;;  %s499_s12 = sphi %s522_s12, %s13_s12  }
   0x2   : > { %p138_p1 = scmp.lt.s32.totalorder %s499_s12, 3 }
   0x4   : > { %p139_p2 = pnand %p433_p0, %p138_p1 }
   0x5   : > { %v184_v0 = vld [vmem:[%s588_s1] sm:$0xff] (!%p139_p2)  ;;  %s434_s16 = sshll.u32 (!%p139_p2), %s429_s13, 3  ;;  %vm192_vm0 = vcmask (!%p139_p2), 64512   ;;  %s501_s27 = smov (!%p139_p2), 120  }
   0x6   : > { %142 = sbr.rel (%p139_p2) target bundleno = 361 (0x169), region = 32  ;;  %468 = vmatprep.subr.mxu0 (!%p139_p2), %v184_v0  ;;  %482 = vmatprep.subr.mxu1 (!%p139_p2), %v184_v0  ;;  %p164_p3 = scmp.lt.s32.totalorder (!%p139_p2), %s434_s16, 15  ;;  %v439_v9 = vld [vmem:[%s589_s2] ss:$0 sm:$0xff] (!%p139_p2) }
   0x7   : > { %469 = vmatpush3.msra.mxu0 (!%p139_p2), %v184_v0  ;;  %483 = vmatpush3.msra.mxu1 (!%p139_p2), %v184_v0 }
   0xd   : > { %s592_s16 = smov (!%p164_p3, %s434_s16), 15 }
   0xe   : > { %s435_s17 = sshll.u32 %s592_s16, 3  ;;  %s458_s21 = sshll.u32 %s592_s16, 4 }
   0xf   : > { %s167_s20 = scalar_lea.vmem %s587_s0, %s435_s17  ;;  %s550_s26 = scalar_lea.vmem %s590_s3, %s458_s21 }
  0x10   : > { %v176_v1 = vld [vmem:[%s167_s20] sm:$0xff]  ;;  %v177_v3 = vld [vmem:[%s167_s20 + $0x8] sm:$0xff]  ;;  %v178_v5 = vld [vmem:[%s167_s20 + $0x10] sm:$0xff] }
  0x11   : > { %v180_v2 = vld [vmem:[%s167_s20 + $0x20] sm:$0xff]  ;;  %470 = vmatprep.mubr.msk.f32.mxu0 %vm192_vm0, %v176_v1  ;;  %v181_v4 = vld [vmem:[%s167_s20 + $0x28] sm:$0xff]  ;;  %v182_v6 = vld [vmem:[%s167_s20 + $0x30] sm:$0xff] }
  0x12   : > { %476 = vmatprep.mubr.msk.f32.mxu1 %vm192_vm0, %v180_v2  ;;  %471 = vmatmul.mubr.msk.f32.vlgmr.msra.gmra.mrb[0].mxu0 %vm192_vm0, %v177_v3  ;;  %v179_v7 = vld [vmem:[%s167_s20 + $0x18] sm:$0xff] }
  0x13   : > { %477 = vmatmul.mubr.msk.f32.vlgmr.msra.gmra.mrb[0].mxu1 %vm192_vm0, %v181_v4  ;;  %473 = vmatprep.mubr.msk.f32.mxu0 %vm192_vm0, %v178_v5  ;;  %v183_v8 = vld [vmem:[%s167_s20 + $0x38] sm:$0xff] }
  0x14   : > { %479 = vmatprep.mubr.msk.f32.mxu1 %vm192_vm0, %v182_v6 }
  0x16   : > { %474 = vmatmul.mubr.msk.f32.gmra.mrb[2].mxu0 %vm192_vm0, %v179_v7 }
  0x17   : > { %480 = vmatmul.mubr.msk.f32.gmra.mrb[2].mxu1 %vm192_vm0, %v183_v8 }
  0xe5   : > { %v472_v10 = vpop.f32.mrb[0].mxu0 }
  0xe6   : > { %v478_v11 = vpop.f32.mrb[0].mxu1  ;;  %v289_v12 = vadd.f32 %v472_v10, %v439_v9  ;;  %v283_v14 = vpop.f32.mrb[1].mxu0 }
  0xe7   : > { %v309_v13 = vadd.f32 %v478_v11, %v439_v9  ;;  %v303_v15 = vpop.f32.mrb[1].mxu1  ;;  %v284_v16 = vadd.f32 %v439_v9, %v283_v14 }
  0xe8   : > { %v304_v17 = vadd.f32 %v439_v9, %v303_v15  ;;  %323 = vst.msk [vmem:[%s550_s26 + $0x10] sm:$0xff] %vm192_vm0, %v289_v12  ;;  %340 = vrot.lane.b32.xlu0 %v289_v12, %s501_s27 }
  0xe9   : > { %327 = vst.msk [vmem:[%s550_s26 + $0x50] sm:$0xff] %vm192_vm0, %v309_v13  ;;  %348 = vrot.lane.b32.xlu1 %v309_v13, %s501_s27  ;;  %322 = vst.msk [vmem:[%s550_s26] sm:$0xff] %vm192_vm0, %v284_v16  ;;  %v475_v18 = vpop.f32.mrb[2].mxu0 }
  0xea   : > { %326 = vst.msk [vmem:[%s550_s26 + $0x40] sm:$0xff] %vm192_vm0, %v304_v17  ;;  %v481_v19 = vpop.f32.mrb[2].mxu1  ;;  %v299_v20 = vadd.f32 %v475_v18, %v439_v9  ;;  %v293_v21 = vpop.f32.mrb[3].mxu0 }
  0xeb   : > { %v319_v22 = vadd.f32 %v481_v19, %v439_v9  ;;  %v313_v23 = vpop.f32.mrb[3].mxu1  ;;  %v294_v24 = vadd.f32 %v439_v9, %v293_v21 }
  0xec   : > { %v314_v25 = vadd.f32 %v439_v9, %v313_v23  ;;  %325 = vst.msk [vmem:[%s550_s26 + $0x30] sm:$0xff] %vm192_vm0, %v299_v20  ;;  %338 = vrot.lane.b32.xlu0 %v284_v16, %s501_s27 }
  0xed   : > { %344 = vrot.lane.b32.xlu1 %v299_v20, %s501_s27  ;;  %329 = vst.msk [vmem:[%s550_s26 + $0x70] sm:$0xff] %vm192_vm0, %v319_v22  ;;  %324 = vst.msk [vmem:[%s550_s26 + $0x20] sm:$0xff] %vm192_vm0, %v294_v24 }
  0xee   : > { %328 = vst.msk [vmem:[%s550_s26 + $0x60] sm:$0xff] %vm192_vm0, %v314_v25 }
  0xf0   : > { %346 = vrot.lane.b32.xlu0 %v304_v17, %s501_s27 }
  0xf1   : > { %342 = vrot.lane.b32.xlu1 %v294_v24, %s501_s27 }
  0xf4   : > { %350 = vrot.lane.b32.xlu0 %v314_v25, %s501_s27 }
  0xf5   : > { %352 = vrot.lane.b32.xlu1 %v319_v22, %s501_s27 }
 0x15a   : > { %v341_v27 = vpop.permute.xlu0 %340 }
 0x15b   : > { %v349_v26 = vpop.permute.xlu1 %348  ;;  %449 = vst.msk [vmem:[%s550_s26 + $0x18] sm:$0xff] %vm192_vm0, %v341_v27 }
 0x15c   : > { %453 = vst.msk [vmem:[%s550_s26 + $0x58] sm:$0xff] %vm192_vm0, %v349_v26 }
 0x15e   : > { %v339_v29 = vpop.permute.xlu0 %338 }
 0x15f   : > { %v345_v28 = vpop.permute.xlu1 %344  ;;  %448 = vst.msk [vmem:[%s550_s26 + $0x8] sm:$0xff] %vm192_vm0, %v339_v29 }
 0x160   : > { %451 = vst.msk [vmem:[%s550_s26 + $0x38] sm:$0xff] %vm192_vm0, %v345_v28 }
 0x162   : > { %v347_v31 = vpop.permute.xlu0 %346 }
 0x163   : > { %v343_v30 = vpop.permute.xlu1 %342  ;;  %452 = vst.msk [vmem:[%s550_s26 + $0x48] sm:$0xff] %vm192_vm0, %v347_v31 }
 0x164   : > { %450 = vst.msk [vmem:[%s550_s26 + $0x28] sm:$0xff] %vm192_vm0, %v343_v30 }
 0x166   : > { %v351_v33 = vpop.permute.xlu0 %350 }
 0x167   : > { %v353_v32 = vpop.permute.xlu1 %352  ;;  %454 = vst.msk [vmem:[%s550_s26 + $0x68] sm:$0xff] %vm192_vm0, %v351_v33 }
 0x168   : > { %455 = vst.msk [vmem:[%s550_s26 + $0x78] sm:$0xff] %vm192_vm0, %v353_v32 }
 0x169 PF: > { %s13_s12 = sadd.s32 1, %s499_s12  }
 0x16a   : > { %p10_p4 = scmp.ge.s32.totalorder %s13_s12, 4  }
 0x16c   :  { %12 = sbr.rel (!%p10_p4) target bundleno = 1 (0x1), region = 63 }

</bundles_post_ra>
